<compile_context>
chip_gen: v6e
topology: v6e:2x2x1
jax: 0.10.0
libtpu: 0.0.40
codegen_flags: <defaults>
</compile_context>

<pallas_src>
import numpy as np
import jax
import jax.numpy as jnp
from jax.experimental import pallas as pl
from jax.experimental.pallas import tpu as pltpu


# ----------------------------------------------------------------------------
# Parameter setup (mirrors PositionalEncoding.create_positional_encoding)
# ----------------------------------------------------------------------------
def create_positional_encoding(d_model: int, max_sequence_length: int) -> jnp.ndarray:
    """Builds the (max_sequence_length, d_model) PE table, float32.

    Faithful to the PyTorch reference, including its nonstandard use of the
    even index `i` directly in the exponent: 10000 ** (2 * i / d_model).
    """
    pe = np.zeros((max_sequence_length, d_model), dtype=np.float64)
    pos = np.arange(max_sequence_length, dtype=np.float64)[:, None]      # (S, 1)
    i_even = np.arange(0, d_model, 2, dtype=np.float64)[None, :]         # (1, ceil(D/2))
    denom = 10000.0 ** (2.0 * i_even / d_model)                          # (1, ceil(D/2))
    angles = pos / denom                                                  # (S, ceil(D/2))
    pe[:, 0::2] = np.sin(angles)
    n_odd = pe[:, 1::2].shape[1]
    pe[:, 1::2] = np.cos(angles[:, :n_odd])
    return jnp.asarray(pe, dtype=jnp.float32)


# ----------------------------------------------------------------------------
# Pallas kernel: broadcast add of a (tS, tD) PE tile onto a (tB, tS, tD) tile
# ----------------------------------------------------------------------------
def _pe_add_kernel(x_ref, pe_ref, o_ref):
    # (tB, tS, tD) + (tS, tD): trailing-dim broadcast, pure VPU add.
    o_ref[...] = x_ref[...] + pe_ref[...]


# ----------------------------------------------------------------------------
# Tile selection
# ----------------------------------------------------------------------------
def _default_tile_budget() -> int:
    """Per-generation x-tile budget: bigger tiles where VMEM allows it."""
    try:
        info = pltpu.get_tpu_info()
        vmem = getattr(info, "vmem_capacity_bytes", None) or 0
        if vmem >= 96 * 1024 * 1024:
            return 8 * 1024 * 1024       # v5e / v6e: 128 MiB VMEM -> fewer grid steps
    except Exception:
        pass
    return 4 * 1024 * 1024               # v7x (64 MiB VMEM) or unknown: conservative


def _choose_tiles(B: int, S: int, D: int, dtype, target_tile_bytes: int,
                  min_grid_steps: int = 4):
    """Pick (tB, tS, tD): lane tile mult-of-128 (or full D), sublane tile a
    multiple of the dtype's packed-sublane count (or full S), batch tile free.
    Enforces a minimum grid so megacore sharding / pipelining stay engaged."""
    itemsize = jnp.dtype(dtype).itemsize
    budget_elems = max(1, target_tile_bytes // itemsize)
    sub = max(8, 32 // itemsize)          # dense sublane pack: 8 f32, 16 bf16, 32 int8/fp8

    # Lane (last) dim.
    if D <= budget_elems:
        tD = D                            # full extent is always a legal block dim
    else:
        tD = max(128, (budget_elems // 128) * 128)

    # Sublane (second-last) dim.
    rows_budget = max(1, budget_elems // max(tD, 1))
    if S <= rows_budget or S <= sub:
        tS = S
    else:
        tS = max(sub, (rows_budget // sub) * sub)

    # Batch (leading) dim: no alignment constraint.
    b_budget = max(1, budget_elems // max(tS * tD, 1))
    tB = max(1, min(B, b_budget))

    # Enforce a minimum number of grid steps (v7x megacore + DMA/compute overlap).
    def n_steps(b, s, d):
        return pl.cdiv(S, s) * pl.cdiv(D, d) * pl.cdiv(B, b)

    while n_steps(tB, tS, tD) < min_grid_steps:
        if tB > 1:
            tB = max(1, tB // 2)
        elif tS > sub and (tS // 2) % sub == 0:
            tS //= 2
        elif tD > 128 and (tD // 2) % 128 == 0:
            tD //= 2
        else:
            break
    return tB, tS, tD


# ----------------------------------------------------------------------------
# Forward wrapper
# ----------------------------------------------------------------------------
def positional_encoding_forward(
    x: jnp.ndarray,
    pe_full: jnp.ndarray,
    *,
    target_tile_bytes: int | None = None,
) -> jnp.ndarray:
    """Equivalent of PositionalEncoding.forward: x + pe[:x.shape[1], :]."""
    B, S, D = x.shape
    # Static slice + dtype cast of the table: wrapper glue, not the hot path.
    # (Cast means bf16 activations add a bf16 PE instead of promoting to f32,
    #  a minor numerics difference vs PyTorch's type promotion.)
    pe = pe_full[:S, :].astype(x.dtype)

    if target_tile_bytes is None:
        target_tile_bytes = _default_tile_budget()

    itemsize = jnp.dtype(x.dtype).itemsize
    tB, tS, tD = _choose_tiles(B, S, D, x.dtype, target_tile_bytes)
    grid = (pl.cdiv(S, tS), pl.cdiv(D, tD), pl.cdiv(B, tB))   # batch innermost

    # VMEM sizing from the actual tiles: x + out double-buffered, PE double-buffered.
    tile_x_bytes = tB * tS * tD * itemsize
    tile_pe_bytes = tS * tD * itemsize
    vmem_needed = 2 * 2 * tile_x_bytes + 2 * tile_pe_bytes
    vmem_limit = int(min(max(2 * vmem_needed + (2 << 20), 32 * 1024 * 1024),
                         100 * 1024 * 1024))

    cost = pl.CostEstimate(
        flops=B * S * D,
        transcendentals=0,
        # x read + out write + PE read once (PE is resident across the batch axis).
        bytes_accessed=(2 * B * S * D + S * D) * itemsize,
    )

    return pl.pallas_call(
        _pe_add_kernel,
        out_shape=jax.ShapeDtypeStruct((B, S, D), x.dtype),
        grid=grid,
        in_specs=[
            # x tile: changes every step.
            pl.BlockSpec((tB, tS, tD), lambda s, d, b: (b, s, d)),
            # PE tile: index_map ignores the innermost batch axis -> block index is
            # constant over the inner loop, so the tile stays resident in VMEM and
            # the PE slab is fetched from HBM exactly once.
            pl.BlockSpec((tS, tD), lambda s, d, b: (s, d)),
        ],
        out_specs=pl.BlockSpec((tB, tS, tD), lambda s, d, b: (b, s, d)),
        compiler_params=pltpu.CompilerParams(
            # Pure elementwise: every axis independent -> megacore split on v7x.
            dimension_semantics=("parallel", "parallel", "parallel"),
            vmem_limit_bytes=vmem_limit,
        ),
        cost_estimate=cost,
    )(x, pe)


# ----------------------------------------------------------------------------
# Demo / correctness check
# ----------------------------------------------------------------------------
if __name__ == "__main__":
    batch = 2
    seq_len = 8
    d_model = 32
    max_sequence_length = 16  # module's max_sequence_length >= seq_len

    key = jax.random.PRNGKey(0)
    x = jax.random.normal(key, (batch, seq_len, d_model), dtype=jnp.float32)

    pe_full = create_positional_encoding(d_model, max_sequence_length)

    out = positional_encoding_forward(x, pe_full)
    out = jax.block_until_ready(out)

    # Pure-JAX reference of the PyTorch forward semantics.
    ref = x + pe_full[:seq_len, :]
    np.testing.assert_allclose(np.asarray(out), np.asarray(ref), rtol=1e-6, atol=1e-6)

    print("KERNEL_OK")
</pallas_src>

<mosaic_0001>
module attributes {stable_mosaic.version = 11 : i64} {
  func.func @_pe_add_kernel(%arg0: i32, %arg1: i32, %arg2: i32, %arg3: memref<1x8x32xf32, #tpu.memory_space<vmem>>, %arg4: memref<8x32xf32, #tpu.memory_space<vmem>>, %arg5: memref<1x8x32xf32, #tpu.memory_space<vmem>>) attributes {dimension_semantics = [#tpu.dimension_semantics<parallel>, #tpu.dimension_semantics<parallel>, #tpu.dimension_semantics<parallel>], iteration_bounds = array<i64: 1, 1, 2>, scalar_prefetch = 0 : i64, scratch_operands = 0 : i64, tpu.core_type = #tpu.core_type<tc>, window_params = [{transform_indices = @transform_0, window_bounds = array<i64: 1, 8, 32>}, {transform_indices = @transform_1, window_bounds = array<i64: 8, 32>}, {transform_indices = @transform_2, window_bounds = array<i64: 1, 8, 32>}]} {
    %c0 = arith.constant 0 : index
    %c0_0 = arith.constant 0 : index
    %c0_1 = arith.constant 0 : index
    %0 = vector.load %arg3[%c0, %c0_0, %c0_1] : memref<1x8x32xf32, #tpu.memory_space<vmem>>, vector<1x8x32xf32>
    %c0_2 = arith.constant 0 : index
    %c0_3 = arith.constant 0 : index
    %1 = vector.load %arg4[%c0_2, %c0_3] : memref<8x32xf32, #tpu.memory_space<vmem>>, vector<8x32xf32>
    %2 = vector.shape_cast %1 : vector<8x32xf32> to vector<1x8x32xf32>
    %3 = arith.addf %0, %2 : vector<1x8x32xf32>
    %c0_4 = arith.constant 0 : index
    %c0_5 = arith.constant 0 : index
    %c0_6 = arith.constant 0 : index
    %4 = vector.load %arg5[%c0_4, %c0_5, %c0_6] : memref<1x8x32xf32, #tpu.memory_space<vmem>>, vector<1x8x32xf32>
    tpu.vector_store %arg5[%c0_4, %c0_5, %c0_6], %3 {strides = array<i32>} : memref<1x8x32xf32, #tpu.memory_space<vmem>>, vector<1x8x32xf32>,
    return
  }
  func.func @transform_0(%arg0: i32, %arg1: i32, %arg2: i32) -> (i32, i32, i32) {
    %c0_i32 = arith.constant 0 : i32
    return %arg2, %arg0, %arg1 : i32, i32, i32
  }
  func.func @transform_1(%arg0: i32, %arg1: i32, %arg2: i32) -> (i32, i32) {
    %c0_i32 = arith.constant 0 : i32
    return %arg0, %arg1 : i32, i32
  }
  func.func @transform_2(%arg0: i32, %arg1: i32, %arg2: i32) -> (i32, i32, i32) {
    %c0_i32 = arith.constant 0 : i32
    return %arg2, %arg0, %arg1 : i32, i32, i32
  }
}

</mosaic_0001>

<bundles_post_ra>
// kernel: tpu_custom_call.1
= control target key start
LH: loop header
LB: loop body
LE: loop exit
PB: predicated region body
PF: predicated region fallthrough
CT: control target
= control target key end

     0   :  { %7 = vsyncpa [#allocation3], 0  ;;  %s737_s0 = inlined_call_operand.hbm [shape: f32[2,8,32], index: 0, kind: input, shape index: {}]   ;;  %s738_s1 = inlined_call_operand.hbm [shape: f32[8,32], index: 1, kind: input, shape index: {}]   ;;  %s739_s2 = inlined_call_operand.hbm [shape: f32[2,8,32], index: 2, kind: output, shape index: {}]  }
   0x1   :  { %9 = vsyncpa [#allocation3 + $0x1], 0 }
   0x2   :  { %10 = vsyncpa [#allocation6], 0 }
   0x3   :  { %11 = vsyncpa [#allocation4], 0 }
   0x4   :  { %13 = vsyncpa [#allocation4 + $0x1], 0  ;;  %s576_s9 = smov 0   ;;  %s578_s10 = smov 0  }
   0x5   :  { %s580_s11 = smov 0   ;;  %s582_s12 = smov 0  }
   0x6   :  { %s584_s13 = smov 0   ;;  %s586_s14 = smov 0  }
   0x7 LB: > { %s330_s15 = sadd.s32 4294967295, %s556_s14   ;;  %s331_s16 = sadd.s32 4294967294, %s556_s14   ;;  %s556_s14 = sphi %s586_s14, %s19_s14   ;;  %s552_s13 = sphi %s584_s13, %s756_s13   ;;  %s548_s12 = sphi %s582_s12, %s755_s12   ;;  %s544_s11 = sphi %s580_s11, %s754_s11   ;;  %s540_s10 = sphi %s578_s10, %s753_s10   ;;  %s536_s9 = sphi %s576_s9, %s752_s9  }
   0x8   : > { %p62_p0 = scmp.ne.s32.totalorder %s540_s10, %s536_s9  ;;  %p610_p1 = scmp.eq.s32.totalorder %s330_s15, 0 }
   0x9   : > { %p614_p2 = scmp.eq.s32.totalorder %s330_s15, 1  ;;  %p124_p3 = scmp.eq.s32.totalorder %s331_s16, 1 }
   0xa   : > { %p620_p4 = por %p610_p1, %p62_p0  ;;  %p332_p5 = scmp.ge.s32.totalorder %s556_s14, 1 }
   0xb   : > { %p625_p6 = por %p124_p3, %p62_p0  ;;  %p131_p7 = scmp.lt.s32.totalorder %s556_s14, 3 }
   0xc   : > { %s743_s19 = scalar_select %p620_p4, 1, 0 }
   0xd   : > { %s744_s20 = scalar_select %p625_p6, 1, 0 }
   0xe   : > { %p630_p8 = pnand %p332_p5, %p131_p7  ;;  %s558_s22 = smov [#allocation5]  }
   0xf   : > { %s147_s23 = sshll.u32 %s558_s22, 4  ;;  %s31_s25 = sadd.s32 1, %s552_s13  ;;  %s148_s23 = int_to_ptr.vmem [resolvable:$true] %s147_s23 }
  0x10   : > { %p353_p10 = pneg %p630_p8  ;;  %s49_s26 = sadd.s32 1, %s544_s11 }
  0x11   : > { %p32_p12 = scmp.ge.s32.totalorder %s31_s25, 2  ;;  %s429_s27 = scalar_lea.vmem %s148_s23, 128 }
  0x12   : > { %p639_p11 = pnand %p353_p10, %p610_p1  ;;  %p430_p0 = scmp.ne.s32.totalorder %s148_s23, %s429_s27 }
  0x13   : > { %p437_p7 = scmp.lt.s32.totalorder %s148_s23, %s148_s23  ;;  %p438_p6 = scmp.lt.s32.totalorder %s429_s27, %s429_s27 }
  0x14   : > { %p420_p13 = pneg %p639_p11 }
  0x15   : > { %p439_p9 = por %p438_p6, %p437_p7 }
  0x16   : > { %p432_p3 = pnand %p430_p0, %p420_p13 }
  0x18   : > { %p433_p5 = pneg %p432_p3 }
  0x1a   : > { %p440_p4 = pnand %p439_p9, %p433_p5 }
  0x1c   : > { %443 = shalt.err (!%p440_p4)
}
  0x1d   : > { %356 = dma.hbm_to_vmem [thread:$0]  (!%p639_p11), %s738_s1, 128, %s148_s23, [#allocation6]  }
  0x1e   : > { %s758_s25 = smov (%p32_p12, %s31_s25), 0  ;;  %p56_p6 = scmp.ne.s32.totalorder %s544_s11, %s540_s10 }
  0x1f   : > { %p57_p4 = scmp.eq.s32.totalorder %s556_s14, 0  ;;  %s42_s30 = ssub.s32 %s552_s13, %s758_s25 }
  0x20   : > { %p366_p9 = scmp.lt.s32.totalorder %s556_s14, 2  ;;  %p47_p10 = scmp.eq.s32.totalorder %s42_s30, 0 }
  0x21   : > { %p58_p13 = por %p57_p4, %p56_p6  ;;  %p662_p0 = por %p614_p2, %p56_p6 }
  0x22   : > { %s158_s4 = sand.u32 1, %s544_s11   ;;  %s336_s7 = sshll.u32 %s552_s13, 7 }
  0x23   : > { %s668_s5 = scalar_select %p47_p10, %s544_s11, %s49_s26  }
  0x24   : > { %s335_s6 = sshll.u32 %s158_s4, 3  ;;  %s169_s16 = scalar_lea.hbm %s737_s0, %s336_s7 }
  0x25   : > { %s162_s22 = scalar_lea.vmem [#allocation2], %s335_s6  ;;  %p674_p11 = pnand %p366_p9, %p58_p13 }
  0x26   : > { %s171_s23 = sshll.u32 %s162_s22, 4  ;;  %s159_s18 = scalar_lea.sflag [#allocation3], %s158_s4  ;;  %s172_s23 = int_to_ptr.vmem [resolvable:$true] %s171_s23 }
  0x27   : > { %p446_p2 = pneg %p674_p11  ;;  %s457_s27 = scalar_lea.vmem %s172_s23, 128 }
  0x28   : > { %p458_p12 = scmp.ne.s32.totalorder %s172_s23, %s457_s27  ;;  %s559_s26 = smov [#allocation2]  }
  0x29   : > { %s462_s28 = sshll.u32 %s559_s26, 4  ;;  %s463_s28 = int_to_ptr.vmem [resolvable:$false] %s462_s28 }
  0x2a   : > { %p460_p3 = pnand %p458_p12, %p446_p2  ;;  %s464_s29 = scalar_lea.vmem %s463_s28, 256 }
  0x2b   : > { %p465_p7 = scmp.lt.s32.totalorder %s172_s23, %s463_s28  ;;  %p466_p6 = scmp.lt.s32.totalorder %s464_s29, %s457_s27 }
  0x2c   : > { %p461_p5 = pneg %p460_p3 }
  0x2d   : > { %p467_p4 = por %p466_p6, %p465_p7 }
  0x2f   : > { %p468_p10 = pnand %p467_p4, %p461_p5 }
  0x31   : > { %471 = shalt.err (!%p468_p10)
}
  0x32   : > { %360 = dma.hbm_to_vmem [thread:$0]  (!%p674_p11), %s169_s16, 128, %s172_s23, %s159_s18  }
  0x33   : > { %180 = sbr.rel (%p630_p8) target bundleno = 83 (0x53), region = 28  ;;  %s685_s30 = sand.u32 (!%p630_p8), 1, %s540_s10  }
  0x34   : > { %s338_s4 = sshll.u32 (!%p630_p8), %s685_s30, 3  ;;  %s183_s6 = scalar_lea.sflag (!%p630_p8), [#allocation3], %s685_s30 }
  0x35   : > { %s186_s7 = scalar_lea.vmem (!%p630_p8), [#allocation2], %s338_s4  ;;  %p749_p9 = scmp.ne.s32.totalorder (!%p630_p8), %s743_s19, 0 }
  0x38   : > { %523 = dma.done.wait (%p749_p9), %s183_s6, 128  }
  0x39   : > { %525 = vsyncadd (%p749_p9), %s183_s6, 4294967168 }
  0x3a   : > { %527 = dma.done.wait (%p610_p1), [#allocation6], 128  }
  0x3b   : > { %529 = vsyncadd (%p610_p1), [#allocation6], 4294967168  ;;  %s210_s21 = scalar_lea.vmem [#allocation7], %s338_s4  ;;  %s342_s15 = sshll.u32 %s548_s12, 7  ;;  %v211_v0 = vld [vmem:[%s186_s7] sm:$0xff]  ;;  %v212_v1 = vld [vmem:[#allocation5] sm:$0xff] }
  0x3c   : > { %s232_s8 = sshll.u32 %s210_s21, 4  ;;  %vm214_vm0 = vcmask 261120   ;;  %v213_v2 = vadd.f32 %v212_v1, %v211_v0  ;;  %s230_s22 = scalar_lea.hbm %s739_s2, %s342_s15  ;;  %s233_s8 = int_to_ptr.vmem [resolvable:$true] %s232_s8 }
  0x3d   : > { %s217_s23 = scalar_lea.sflag [#allocation4], %s685_s30  ;;  %s472_s24 = scalar_lea.vmem %s233_s8, 128 }
  0x3e   : > { %215 = vst.msk [vmem:[%s210_s21] sm:$0xff] %vm214_vm0, %v213_v2  ;;  %p473_p8 = scmp.ne.s32.totalorder %s233_s8, %s472_s24  ;;  %s560_s17 = smov [#allocation7]  }
  0x3f   : > { %s476_s18 = sshll.u32 %s560_s17, 4  ;;  %s477_s18 = int_to_ptr.vmem [resolvable:$false] %s476_s18 }
  0x40   : > { %p474_p1 = pnand %p473_p8, %p662_p0  ;;  %s478_s12 = scalar_lea.vmem %s477_s18, 256 }
  0x41   : > { %p479_p11 = scmp.lt.s32.totalorder %s233_s8, %s477_s18  ;;  %p480_p2 = scmp.lt.s32.totalorder %s478_s12, %s472_s24 }
  0x42   : > { %p475_p13 = pneg %p474_p1 }
  0x43   : > { %p481_p12 = por %p480_p2, %p479_p11 }
  0x45   : > { %p482_p3 = pnand %p481_p12, %p475_p13 }
  0x47   : > { %485 = shalt.err (!%p482_p3)
}
  0x48   : > { %s486_s27 = scalar_lea.hbm %s230_s22, 128  ;;  %s490_s29 = scalar_lea.hbm %s739_s2, 256 }
  0x49   : > { %p487_p5 = scmp.ne.s32.totalorder %s230_s22, %s486_s27  ;;  %p491_p4 = scmp.lt.s32.totalorder %s230_s22, %s739_s2 }
  0x4a   : > { %p492_p10 = scmp.lt.s32.totalorder %s490_s29, %s486_s27 }
  0x4b   : > { %p488_p7 = pnand %p487_p5, %p662_p0 }
  0x4c   : > { %p493_p9 = por %p492_p10, %p491_p4 }
  0x4d   : > { %p489_p6 = pneg %p488_p7 }
  0x4f   : > { %p494_p8 = pnand %p493_p9, %p489_p6 }
  0x51   : > { %497 = shalt.err (!%p494_p8)
}
  0x52   : > { %351 = dma.vmem_to_hbm [thread:$0]  (%p662_p0), %s233_s8, 128, %s230_s22, %s217_s23  }
  0x53 PF: > { %s244_s6 = sand.u32 1, %s536_s9   ;;  %p750_p1 = scmp.ne.s32.totalorder %s744_s20, 0 }
  0x54   : > { %p751_p13 = scmp.ge.s32.totalorder %s556_s14, 2  ;;  %s245_s7 = scalar_lea.sflag [#allocation4], %s244_s6 }
  0x56   : > { %p362_p11 = pnand %p751_p13, %p750_p1 }
  0x58   : > { %p363_p2 = pneg %p362_p11 }
  0x5a   : > { %531 = dma.done.wait (%p363_p2), %s245_s7, 128  }
  0x5b   : > { %533 = vsyncadd (%p363_p2), %s245_s7, 4294967168  ;;  %s19_s14 = sadd.s32 1, %s556_s14   ;;  %s752_s9 = smov %s540_s10 }
  0x5c   : > { %p16_p12 = scmp.ge.s32.totalorder %s19_s14, 4   ;;  %s753_s10 = smov %s544_s11 }
  0x5d   : > { %s754_s11 = smov %s668_s5  ;;  %s755_s12 = smov %s552_s13 }
  0x5e   : > { %s756_s13 = smov %s758_s25  ;;  %18 = sbr.rel (!%p16_p12) target bundleno = 7 (0x7), region = 78 }
  0x63   :  { %250 = vsyncpa [#allocation3], 1 }
  0x64   :  { %252 = vsyncpa [#allocation3 + $0x1], 1 }
  0x65   :  { %253 = vsyncpa [#allocation6], 1 }
  0x66   :  { %254 = vsyncpa [#allocation4], 1 }
  0x67   :  { %256 = vsyncpa [#allocation4 + $0x1], 1 }

</bundles_post_ra>
